<compile_context>
chip_gen: v6e
topology: v6e:2x2x1
jax: 0.10.0
libtpu: 0.0.40
codegen_flags: <defaults>
</compile_context>

<pallas_src>
import math
from functools import partial

import jax
import jax.numpy as jnp
from jax.experimental import pallas as pl
from jax.experimental.pallas import tpu as pltpu


def _ffn_kernel(x_ref, gamma_ref, beta_ref, w1_ref, b1_ref, w2_ref, b2_ref,
                o_ref, xn_ref, acc_ref, *, eps):
    # x_ref:  (TM, D)        gamma/beta/b2: (1, D)
    # w1_ref: (D, TH)        b1_ref: (1, TH)
    # w2_ref: (TH, D)
    # xn_ref: (TM, D) scratch (weights' dtype)   acc_ref: (TM, D) f32 scratch
    k = pl.program_id(1)
    nk = pl.num_programs(1)

    @pl.when(k == 0)
    def _init():
        # LayerNorm stats in f32; fold rsqrt(var+eps)*gamma into one scale so
        # the affine is a single multiply-add. Computed once per token tile
        # and cached in xn_ref for all hidden (K) tiles.
        x = x_ref[...].astype(jnp.float32)
        mu = jnp.mean(x, axis=-1, keepdims=True)
        xc = x - mu
        var = jnp.mean(xc * xc, axis=-1, keepdims=True)
        scale = jax.lax.rsqrt(var + eps) * gamma_ref[...].astype(jnp.float32)
        xn = xc * scale + beta_ref[...].astype(jnp.float32)
        xn_ref[...] = xn.astype(xn_ref.dtype)
        # Seed the accumulator with the output bias -> finalize is a pure cast.
        acc_ref[...] = jnp.broadcast_to(
            b2_ref[...].astype(jnp.float32), acc_ref.shape)

    # Linear(dim -> hidden chunk): native-dtype MXU operands, f32 accumulation.
    h = jnp.dot(xn_ref[...], w1_ref[...], preferred_element_type=jnp.float32)
    h = h + b1_ref[...].astype(jnp.float32)

    # GELU (exact erf form -> matches nn.GELU() default numerics).
    h = 0.5 * h * (1.0 + jax.lax.erf(h * (1.0 / math.sqrt(2.0))))
    # Dropout(p=0.0) is identity -> no-op.

    # Partial Linear(hidden chunk -> dim), accumulated in the f32 scratch.
    acc_ref[...] += jnp.dot(h.astype(w2_ref.dtype), w2_ref[...],
                            preferred_element_type=jnp.float32)

    @pl.when(k == nk - 1)
    def _finalize():
        o_ref[...] = acc_ref[...].astype(o_ref.dtype)


def _round_up(a, m):
    return ((a + m - 1) // m) * m


def _device_config():
    """Per-generation tile targets, core count and VMEM capacity."""
    kind = ""
    try:
        kind = jax.devices()[0].device_kind.lower()
    except Exception:
        pass
    vmem_cap = None
    try:
        vmem_cap = int(pltpu.get_tpu_info().vmem_capacity_bytes)
    except Exception:
        pass
    if "v7" in kind:
        # v7x: 64 MiB VMEM / TC, 2 TCs, ~310 flops/B compute:BW balance.
        cfg = dict(tm=512, th=512, cores=2, vmem=64 << 20)
    elif "v6" in kind:
        # v6e: 128 MiB VMEM, ~650 flops/B balance -> big TM pays off.
        cfg = dict(tm=512, th=1024, cores=1, vmem=128 << 20)
    elif "v5" in kind:
        # v5e: ~240 flops/B balance; 128-aligned tiles are enough.
        cfg = dict(tm=256, th=1024, cores=1, vmem=128 << 20)
    else:
        # Unknown / CPU-interpret fallback: conservative (v7x-safe) sizes.
        cfg = dict(tm=256, th=512, cores=2, vmem=64 << 20)
    if vmem_cap:
        cfg["vmem"] = vmem_cap
    return cfg


def feed_forward(x, params, *, eps=1e-5,
                 tokens_per_tile=None, hidden_per_tile=None,
                 weight_dtype=None):
    """x: (batch, seq, dim) -> (batch, seq, dim).

    tokens_per_tile / hidden_per_tile override the generation-specific
    defaults. weight_dtype (e.g. jnp.bfloat16) casts W1/b1/W2 before the call
    to halve the dominant HBM weight stream (f32 accumulation is kept).
    """
    gamma, beta, w1, b1, w2, b2 = params
    if weight_dtype is not None:
        w1 = w1.astype(weight_dtype)
        b1 = b1.astype(weight_dtype)
        w2 = w2.astype(weight_dtype)

    B, S, D = x.shape
    H = w1.shape[1]
    N = B * S
    x2 = x.reshape(N, D)

    cfg = _device_config()
    target_tm = tokens_per_tile if tokens_per_tile is not None else cfg["tm"]
    target_th = hidden_per_tile if hidden_per_tile is not None else cfg["th"]

    xsz = jnp.dtype(x.dtype).itemsize
    wsz = jnp.dtype(w1.dtype).itemsize

    # --- token tiling: TM multiple of 8 (sublanes); pad N (no assert) ---
    TM = min(target_tm, _round_up(N, 8))
    # On 2-TensorCore parts keep >= 2 token tiles so the "parallel" axis can
    # shard across cores (don't collapse to a single tile for short seqs).
    if cfg["cores"] > 1 and N > 8:
        TM = min(TM, _round_up((N + 1) // 2, 8))
    TM = max(TM, 8)

    # --- hidden (K) tiling: stream W1/W2 through VMEM ---
    TH = H if H <= target_th else target_th   # TH multiple of 128 when < H

    # Shrink tiles if the double-buffered working set would blow the per-core
    # VMEM cap (matters for f32 weights and for v7x's 64 MiB VMEM).
    def _budget(tm, th):
        return (2 * tm * D * xsz                    # x tiles
                + 2 * (D * th + th * D + th) * wsz  # W1/W2/b1 tiles
                + 2 * tm * D * xsz                  # out tiles
                + tm * D * 4                        # f32 accumulator
                + tm * D * wsz                      # cached LayerNorm
                + 6 * D * 4)                        # gamma/beta/b2

    vmem_cap = int(cfg["vmem"] * 0.85)
    while _budget(TM, TH) > vmem_cap and TH > 128 and TH % 256 == 0:
        TH //= 2
    while _budget(TM, TH) > vmem_cap and TM > 8 and TM % 16 == 0:
        TM //= 2

    Np = _round_up(N, TM)
    if Np != N:
        x2 = jnp.pad(x2, ((0, Np - N), (0, 0)))

    Hp = H if TH == H else _round_up(H, TH)
    if Hp != H:
        # zero-padded hidden columns contribute gelu(0) @ 0 == 0
        w1 = jnp.pad(w1, ((0, 0), (0, Hp - H)))
        b1 = jnp.pad(b1, ((0, 0), (0, Hp - H)))
        w2 = jnp.pad(w2, ((0, Hp - H), (0, 0)))

    grid = (Np // TM, Hp // TH)  # (parallel token tiles, arbitrary K tiles)
    num_token_tiles = grid[0]

    # Advisory cost estimate for the XLA scheduler. Weights are re-streamed
    # from HBM once per token tile, so count them (Np/TM) times.
    cost = pl.CostEstimate(
        flops=int(4 * Np * D * Hp),
        transcendentals=int(Np * Hp),
        bytes_accessed=int(2 * Np * D * xsz                       # x + out
                           + num_token_tiles
                           * (w1.size + w2.size + b1.size) * wsz  # weights
                           + (b2.size + gamma.size + beta.size)
                           * jnp.dtype(gamma.dtype).itemsize),
    )

    # Scoped VMEM: ask for what we need (+25% headroom), never exceed ~85% of
    # the device's physical per-core VMEM (64 MiB on v7x, 128 MiB v5e/v6e).
    vmem_limit = int(min(max(_budget(TM, TH) * 5 // 4, 32 << 20), vmem_cap))

    out = pl.pallas_call(
        partial(_ffn_kernel, eps=eps),
        out_shape=jax.ShapeDtypeStruct((Np, D), x.dtype),
        grid_spec=pltpu.PrefetchScalarGridSpec(
            num_scalar_prefetch=0,
            grid=grid,
            in_specs=[
                pl.BlockSpec((TM, D), lambda i, k: (i, 0)),   # x (k-invariant)
                pl.BlockSpec((1, D), lambda i, k: (0, 0)),    # gamma
                pl.BlockSpec((1, D), lambda i, k: (0, 0)),    # beta
                pl.BlockSpec((D, TH), lambda i, k: (0, k)),   # W1 chunk
                pl.BlockSpec((1, TH), lambda i, k: (0, k)),   # b1 chunk
                pl.BlockSpec((TH, D), lambda i, k: (k, 0)),   # W2 chunk
                pl.BlockSpec((1, D), lambda i, k: (0, 0)),    # b2
            ],
            out_specs=pl.BlockSpec((TM, D), lambda i, k: (i, 0)),
            scratch_shapes=[
                pltpu.VMEM((TM, D), w1.dtype),     # cached LayerNorm output
                pltpu.VMEM((TM, D), jnp.float32),  # f32 output accumulator
            ],
        ),
        compiler_params=pltpu.CompilerParams(
            dimension_semantics=("parallel", "arbitrary"),
            vmem_limit_bytes=vmem_limit,
        ),
        cost_estimate=cost,
    )(x2, gamma, beta, w1, b1, w2, b2)

    if Np != N:
        out = out[:N]
    return out.reshape(B, S, D)


def init_params(key, dim, hidden_dim, dtype=jnp.float32):
    """Deterministic synthetic parameters (shapes match the PyTorch module)."""
    k1, k2, k3, k4 = jax.random.split(key, 4)
    # nn.LayerNorm default init: weight=1, bias=0.
    gamma = jnp.ones((1, dim), dtype)
    beta = jnp.zeros((1, dim), dtype)
    # nn.Linear-style uniform init, stored as (in, out) for x @ W.
    lim1 = 1.0 / math.sqrt(dim)
    w1 = jax.random.uniform(k1, (dim, hidden_dim), dtype, -lim1, lim1)
    b1 = jax.random.uniform(k2, (1, hidden_dim), dtype, -lim1, lim1)
    lim2 = 1.0 / math.sqrt(hidden_dim)
    w2 = jax.random.uniform(k3, (hidden_dim, dim), dtype, -lim2, lim2)
    b2 = jax.random.uniform(k4, (1, dim), dtype, -lim2, lim2)
    return gamma, beta, w1, b1, w2, b2


def feed_forward_ref(x, params, *, eps=1e-5):
    gamma, beta, w1, b1, w2, b2 = params
    xf = x.astype(jnp.float32)
    mu = jnp.mean(xf, axis=-1, keepdims=True)
    var = jnp.mean((xf - mu) ** 2, axis=-1, keepdims=True)
    xn = (xf - mu) * jax.lax.rsqrt(var + eps) * gamma[0] + beta[0]
    h = xn @ w1 + b1[0]
    h = 0.5 * h * (1.0 + jax.lax.erf(h / math.sqrt(2.0)))
    y = h @ w2 + b2[0]
    return y.astype(x.dtype)


if __name__ == "__main__":
    batch, seq, dim, hidden_dim = 2, 8, 32, 64

    key = jax.random.PRNGKey(0)
    kx, kp = jax.random.split(key)
    x = jax.random.normal(kx, (batch, seq, dim), jnp.float32)
    params = init_params(kp, dim, hidden_dim)

    ref = feed_forward_ref(x, params)

    # Full-precision path: must match the f32 reference tightly.
    out = jax.block_until_ready(feed_forward(x, params))
    assert out.shape == (batch, seq, dim)
    assert jnp.allclose(out, ref, atol=1e-5, rtol=1e-5), "mismatch vs reference"

    # Mixed-precision path (bf16 weight stream, f32 accumulation): looser tol.
    out_bf16 = jax.block_until_ready(
        feed_forward(x, params, weight_dtype=jnp.bfloat16))
    assert out_bf16.shape == (batch, seq, dim)
    assert jnp.allclose(out_bf16, ref, atol=5e-2, rtol=5e-2), "bf16 path diverged"

    print("KERNEL_OK")
</pallas_src>

<mosaic_0001>
module attributes {stable_mosaic.version = 11 : i64} {
  func.func @_ffn_kernel(%arg0: i32, %arg1: i32, %arg2: memref<8x32xf32, #tpu.memory_space<vmem>>, %arg3: memref<1x32xf32, #tpu.memory_space<vmem>>, %arg4: memref<1x32xf32, #tpu.memory_space<vmem>>, %arg5: memref<32x64xf32, #tpu.memory_space<vmem>>, %arg6: memref<1x64xf32, #tpu.memory_space<vmem>>, %arg7: memref<64x32xf32, #tpu.memory_space<vmem>>, %arg8: memref<1x32xf32, #tpu.memory_space<vmem>>, %arg9: memref<8x32xf32, #tpu.memory_space<vmem>>, %arg10: memref<8x32xf32, #tpu.memory_space<vmem>>, %arg11: memref<8x32xf32, #tpu.memory_space<vmem>>) attributes {dimension_semantics = [#tpu.dimension_semantics<parallel>, #tpu.dimension_semantics<arbitrary>], iteration_bounds = array<i64: 2, 1>, scalar_prefetch = 0 : i64, scratch_operands = 2 : i64, tpu.core_type = #tpu.core_type<tc>, window_params = [{transform_indices = @transform_0, window_bounds = array<i64: 8, 32>}, {pipeline_mode = #tpu.pipeline_mode<synchronous>, transform_indices = @transform_1, window_bounds = array<i64: 1, 32>}, {pipeline_mode = #tpu.pipeline_mode<synchronous>, transform_indices = @transform_2, window_bounds = array<i64: 1, 32>}, {transform_indices = @transform_3, window_bounds = array<i64: 32, 64>}, {transform_indices = @transform_4, window_bounds = array<i64: 1, 64>}, {transform_indices = @transform_5, window_bounds = array<i64: 64, 32>}, {pipeline_mode = #tpu.pipeline_mode<synchronous>, transform_indices = @transform_6, window_bounds = array<i64: 1, 32>}, {transform_indices = @transform_7, window_bounds = array<i64: 8, 32>}]} {
    %c0_i32 = arith.constant 0 : i32
    %0 = arith.cmpi eq, %arg1, %c0_i32 : i32
    %1 = arith.extui %0 : i1 to i32
    %c0_i32_0 = arith.constant 0 : i32
    %2 = arith.cmpi ne, %1, %c0_i32_0 : i32
    scf.if %2 {
      %c0_18 = arith.constant 0 : index
      %c0_19 = arith.constant 0 : index
      %25 = vector.load %arg2[%c0_18, %c0_19] : memref<8x32xf32, #tpu.memory_space<vmem>>, vector<8x32xf32>
      %cst_20 = arith.constant dense<0.000000e+00> : vector<8xf32>
      %26 = vector.multi_reduction <add>, %25, %cst_20 [1] : vector<8x32xf32> to vector<8xf32>
      %27 = vector.shape_cast %26 : vector<8xf32> to vector<8x1xf32>
      %cst_21 = arith.constant 3.200000e+01 : f32
      %28 = vector.broadcast %cst_21 : f32 to vector<8x1xf32>
      %29 = arith.divf %27, %28 : vector<8x1xf32>
      %30 = vector.broadcast %29 : vector<8x1xf32> to vector<8x32xf32>
      %31 = arith.subf %25, %30 : vector<8x32xf32>
      %32 = arith.mulf %31, %31 : vector<8x32xf32>
      %cst_22 = arith.constant dense<0.000000e+00> : vector<8xf32>
      %33 = vector.multi_reduction <add>, %32, %cst_22 [1] : vector<8x32xf32> to vector<8xf32>
      %34 = vector.shape_cast %33 : vector<8xf32> to vector<8x1xf32>
      %cst_23 = arith.constant 3.200000e+01 : f32
      %35 = vector.broadcast %cst_23 : f32 to vector<8x1xf32>
      %36 = arith.divf %34, %35 : vector<8x1xf32>
      %cst_24 = arith.constant 9.99999974E-6 : f32
      %37 = vector.broadcast %cst_24 : f32 to vector<8x1xf32>
      %38 = arith.addf %36, %37 : vector<8x1xf32>
      %39 = math.rsqrt %38 : vector<8x1xf32>
      %c0_25 = arith.constant 0 : index
      %c0_26 = arith.constant 0 : index
      %40 = vector.load %arg3[%c0_25, %c0_26] : memref<1x32xf32, #tpu.memory_space<vmem>>, vector<1x32xf32>
      %41 = vector.broadcast %39 : vector<8x1xf32> to vector<8x32xf32>
      %42 = vector.broadcast %40 : vector<1x32xf32> to vector<8x32xf32>
      %43 = arith.mulf %41, %42 : vector<8x32xf32>
      %44 = arith.mulf %31, %43 : vector<8x32xf32>
      %c0_27 = arith.constant 0 : index
      %c0_28 = arith.constant 0 : index
      %45 = vector.load %arg4[%c0_27, %c0_28] : memref<1x32xf32, #tpu.memory_space<vmem>>, vector<1x32xf32>
      %46 = vector.broadcast %45 : vector<1x32xf32> to vector<8x32xf32>
      %47 = arith.addf %44, %46 : vector<8x32xf32>
      %c0_29 = arith.constant 0 : index
      %c0_30 = arith.constant 0 : index
      %48 = vector.load %arg10[%c0_29, %c0_30] : memref<8x32xf32, #tpu.memory_space<vmem>>, vector<8x32xf32>
      tpu.vector_store %arg10[%c0_29, %c0_30], %47 {strides = array<i32>} : memref<8x32xf32, #tpu.memory_space<vmem>>, vector<8x32xf32>,
      %c0_31 = arith.constant 0 : index
      %c0_32 = arith.constant 0 : index
      %49 = vector.load %arg8[%c0_31, %c0_32] : memref<1x32xf32, #tpu.memory_space<vmem>>, vector<1x32xf32>
      %50 = vector.shape_cast %49 : vector<1x32xf32> to vector<1x32xf32>
      %51 = vector.broadcast %50 : vector<1x32xf32> to vector<8x32xf32>
      %c0_33 = arith.constant 0 : index
      %c0_34 = arith.constant 0 : index
      %52 = vector.load %arg11[%c0_33, %c0_34] : memref<8x32xf32, #tpu.memory_space<vmem>>, vector<8x32xf32>
      tpu.vector_store %arg11[%c0_33, %c0_34], %51 {strides = array<i32>} : memref<8x32xf32, #tpu.memory_space<vmem>>, vector<8x32xf32>,
    } else {
    }
    %c0 = arith.constant 0 : index
    %c0_1 = arith.constant 0 : index
    %3 = vector.load %arg10[%c0, %c0_1] : memref<8x32xf32, #tpu.memory_space<vmem>>, vector<8x32xf32>
    %c0_2 = arith.constant 0 : index
    %c0_3 = arith.constant 0 : index
    %4 = vector.load %arg5[%c0_2, %c0_3] : memref<32x64xf32, #tpu.memory_space<vmem>>, vector<32x64xf32>
    %cst = arith.constant dense<0.000000e+00> : vector<8x64xf32>
    %5 = tpu.matmul %3, %4, %cst {dimension_numbers = #tpu.dot_dimension_numbers<[1], [0], [0], [1], [0, 0, 1, 1], [], []>} : vector<8x32xf32>, vector<32x64xf32>, vector<8x64xf32> -> vector<8x64xf32>
    %c0_4 = arith.constant 0 : index
    %c0_5 = arith.constant 0 : index
    %6 = vector.load %arg6[%c0_4, %c0_5] : memref<1x64xf32, #tpu.memory_space<vmem>>, vector<1x64xf32>
    %7 = vector.broadcast %6 : vector<1x64xf32> to vector<8x64xf32>
    %8 = arith.addf %5, %7 : vector<8x64xf32>
    %cst_6 = arith.constant 5.000000e-01 : f32
    %9 = vector.broadcast %cst_6 : f32 to vector<8x64xf32>
    %10 = arith.mulf %9, %8 : vector<8x64xf32>
    %cst_7 = arith.constant 0.707106769 : f32
    %11 = vector.broadcast %cst_7 : f32 to vector<8x64xf32>
    %12 = arith.mulf %8, %11 : vector<8x64xf32>
    %13 = math.erf %12 : vector<8x64xf32>
    %cst_8 = arith.constant 1.000000e+00 : f32
    %14 = vector.broadcast %cst_8 : f32 to vector<8x64xf32>
    %15 = arith.addf %14, %13 : vector<8x64xf32>
    %16 = arith.mulf %10, %15 : vector<8x64xf32>
    %c0_9 = arith.constant 0 : index
    %c0_10 = arith.constant 0 : index
    %17 = vector.load %arg11[%c0_9, %c0_10] : memref<8x32xf32, #tpu.memory_space<vmem>>, vector<8x32xf32>
    %c0_11 = arith.constant 0 : index
    %c0_12 = arith.constant 0 : index
    %18 = vector.load %arg7[%c0_11, %c0_12] : memref<64x32xf32, #tpu.memory_space<vmem>>, vector<64x32xf32>
    %cst_13 = arith.constant dense<0.000000e+00> : vector<8x32xf32>
    %19 = tpu.matmul %16, %18, %cst_13 {dimension_numbers = #tpu.dot_dimension_numbers<[1], [0], [0], [1], [0, 0, 1, 1], [], []>} : vector<8x64xf32>, vector<64x32xf32>, vector<8x32xf32> -> vector<8x32xf32>
    %20 = arith.addf %17, %19 : vector<8x32xf32>
    %c0_14 = arith.constant 0 : index
    %c0_15 = arith.constant 0 : index
    %21 = vector.load %arg11[%c0_14, %c0_15] : memref<8x32xf32, #tpu.memory_space<vmem>>, vector<8x32xf32>
    tpu.vector_store %arg11[%c0_14, %c0_15], %20 {strides = array<i32>} : memref<8x32xf32, #tpu.memory_space<vmem>>, vector<8x32xf32>,
    %c0_i32_16 = arith.constant 0 : i32
    %22 = arith.cmpi eq, %arg1, %c0_i32_16 : i32
    %23 = arith.extui %22 : i1 to i32
    %c0_i32_17 = arith.constant 0 : i32
    %24 = arith.cmpi ne, %23, %c0_i32_17 : i32
    scf.if %24 {
      %c0_18 = arith.constant 0 : index
      %c0_19 = arith.constant 0 : index
      %25 = vector.load %arg11[%c0_18, %c0_19] : memref<8x32xf32, #tpu.memory_space<vmem>>, vector<8x32xf32>
      %c0_20 = arith.constant 0 : index
      %c0_21 = arith.constant 0 : index
      %26 = vector.load %arg9[%c0_20, %c0_21] : memref<8x32xf32, #tpu.memory_space<vmem>>, vector<8x32xf32>
      tpu.vector_store %arg9[%c0_20, %c0_21], %25 {strides = array<i32>} : memref<8x32xf32, #tpu.memory_space<vmem>>, vector<8x32xf32>,
    } else {
    }
    return
  }
  func.func @transform_0(%arg0: i32, %arg1: i32) -> (i32, i32) {
    %c0_i32 = arith.constant 0 : i32
    %c0_i32_0 = arith.constant 0 : i32
    return %arg0, %c0_i32 : i32, i32
  }
  func.func @transform_1(%arg0: i32, %arg1: i32) -> (i32, i32) {
    %c0_i32 = arith.constant 0 : i32
    %c0_i32_0 = arith.constant 0 : i32
    %c0_i32_1 = arith.constant 0 : i32
    return %c0_i32, %c0_i32_0 : i32, i32
  }
  func.func @transform_2(%arg0: i32, %arg1: i32) -> (i32, i32) {
    %c0_i32 = arith.constant 0 : i32
    %c0_i32_0 = arith.constant 0 : i32
    %c0_i32_1 = arith.constant 0 : i32
    return %c0_i32, %c0_i32_0 : i32, i32
  }
  func.func @transform_3(%arg0: i32, %arg1: i32) -> (i32, i32) {
    %c0_i32 = arith.constant 0 : i32
    %c0_i32_0 = arith.constant 0 : i32
    return %c0_i32, %arg1 : i32, i32
  }
  func.func @transform_4(%arg0: i32, %arg1: i32) -> (i32, i32) {
    %c0_i32 = arith.constant 0 : i32
    %c0_i32_0 = arith.constant 0 : i32
    return %c0_i32, %arg1 : i32, i32
  }
  func.func @transform_5(%arg0: i32, %arg1: i32) -> (i32, i32) {
    %c0_i32 = arith.constant 0 : i32
    %c0_i32_0 = arith.constant 0 : i32
    return %arg1, %c0_i32 : i32, i32
  }
  func.func @transform_6(%arg0: i32, %arg1: i32) -> (i32, i32) {
    %c0_i32 = arith.constant 0 : i32
    %c0_i32_0 = arith.constant 0 : i32
    %c0_i32_1 = arith.constant 0 : i32
    return %c0_i32, %c0_i32_0 : i32, i32
  }
  func.func @transform_7(%arg0: i32, %arg1: i32) -> (i32, i32) {
    %c0_i32 = arith.constant 0 : i32
    %c0_i32_0 = arith.constant 0 : i32
    return %arg0, %c0_i32 : i32, i32
  }
}

</mosaic_0001>

<bundles_post_ra>
// kernel: tpu_custom_call.1
= control target key start
LH: loop header
LB: loop body
LE: loop exit
PB: predicated region body
PF: predicated region fallthrough
CT: control target
= control target key end

     0   :  { %12 = vsyncpa [#allocation5], 0  ;;  %s1094_s0 = inlined_call_operand.vmem [shape: f32[16,32], index: 0, kind: input, shape index: {}]   ;;  %s1095_s1 = inlined_call_operand.vmem [shape: f32[1,32], index: 1, kind: input, shape index: {}]   ;;  %s1096_s2 = inlined_call_operand.vmem [shape: f32[1,32], index: 2, kind: input, shape index: {}]   ;;  %s1097_s3 = inlined_call_operand.vmem [shape: f32[32,64], index: 3, kind: input, shape index: {}]   ;;  %s1098_s4 = inlined_call_operand.vmem [shape: f32[1,64], index: 4, kind: input, shape index: {}]   ;;  %s1099_s5 = inlined_call_operand.vmem [shape: f32[64,32], index: 5, kind: input, shape index: {}]   ;;  %s1100_s6 = inlined_call_operand.vmem [shape: f32[1,32], index: 6, kind: input, shape index: {}]   ;;  %s1101_s7 = inlined_call_operand.hbm [shape: f32[16,32], index: 7, kind: output, shape index: {}]  }
   0x1   :  { %14 = vsyncpa [#allocation5 + $0x1], 0  ;;  %s934_s24 = smov 0   ;;  %s936_s25 = smov 0  }
   0x2   :  { %s938_s26 = smov 0   ;;  %s940_s27 = smov 0  }
   0x3   :  { %s942_s28 = smov 0   ;;  %s944_s29 = smov 0  }
   0x4 LB: > { %s688_s30 = sadd.s32 4294967295, %s889_s29   ;;  %s689_s8 = sadd.s32 4294967294, %s889_s29   ;;  %s889_s29 = sphi %s944_s29, %s20_s29   ;;  %s885_s28 = sphi %s942_s28, %s1108_s28   ;;  %s881_s27 = sphi %s940_s27, %s1107_s27   ;;  %s877_s26 = sphi %s938_s26, %s1106_s26   ;;  %s873_s25 = sphi %s936_s25, %s1105_s25   ;;  %s869_s24 = sphi %s934_s24, %s1104_s24  }
   0x5   : > { %s32_s9 = sadd.s32 1, %s885_s28  ;;  %s206_s10 = sadd.s32 1, %s877_s26 }
   0x6   : > { %p34_p0 = scmp.ge.s32.totalorder %s32_s9, 2  ;;  %p216_p1 = scmp.ne.s32.totalorder %s877_s26, %s873_s25 }
   0x7   : > { %p217_p2 = scmp.eq.s32.totalorder %s688_s30, 1  ;;  %p222_p3 = scmp.ne.s32.totalorder %s873_s25, %s869_s24 }
   0x8   : > { %s1110_s9 = smov (%p34_p0, %s32_s9), 0  ;;  %p223_p5 = scmp.eq.s32.totalorder %s689_s8, 1 }
   0x9   : > { %p974_p4 = por %p217_p2, %p216_p1  ;;  %s203_s12 = ssub.s32 %s885_s28, %s1110_s9 }
   0xa   : > { %p695_p6 = scmp.ge.s32.totalorder %s889_s29, 1  ;;  %p204_p7 = scmp.eq.s32.totalorder %s203_s12, 0 }
   0xb   : > { %p981_p8 = por %p223_p5, %p222_p3  ;;  %p279_p9 = scmp.lt.s32.totalorder %s889_s29, 3 }
   0xc   : > { %s987_s14 = scalar_select %p204_p7, %s877_s26, %s206_s10  }
   0xd   : > { %p280_p10 = pnand %p695_p6, %p279_p9 }
   0xe   : > { %p322_p11 = scmp.lt.s32.totalorder (!%p280_p10), %s881_s27, 1  ;;  %s319_s10 = sand.u32 (!%p280_p10), 1, %s873_s25  }
   0xf   : > { %283 = sbr.rel (%p280_p10) target bundleno = 772 (0x304), region = 48  ;;  %s696_s12 = sshll.u32 (!%p280_p10), %s319_s10, 3 }
  0x10   : > { %s566_s21 = scalar_lea.sflag (!%p280_p10), [#allocation5], %s319_s10  ;;  %s893_s23 = smov (!%p280_p10), [#allocation4]  }
  0x11   : > { %s817_s30 = sshll.u32 (!%p280_p10), %s893_s23, 4  ;;  %s818_s30 = int_to_ptr.vmem [resolvable:$false] %s817_s30 }
  0x14   : > { %s323_s15 = scalar_select %p322_p11, %s881_s27, 1  ;;  %vm344_vm0 = vcmask 261120   ;;  %v891_v7 = vmov 0.0   ;;  %v388_v8 = vld [vmem:[%s1097_s3 + $0x18] sm:$0xff]  ;;  %v387_v9 = vld [vmem:[%s1097_s3 + $0x10] sm:$0xff]  ;;  %vm892_vm1 = vmmov 0  }
  0x15   : > { %722 = vmatprep.subr.mxu0 %v891_v7  ;;  %733 = vmatprep.subr.mxu1 %v891_v7  ;;  %v386_v10 = vld [vmem:[%s1097_s3 + $0x8] sm:$0xff]  ;;  %v385_v11 = vld [vmem:[%s1097_s3] sm:$0xff]  ;;  %v483_v22 = vld [vmem:[%s1099_s5 + $0x38] sm:$0xff]  ;;  %vm484_vm2 = vcmask 523264  }
  0x16   : > { %s697_s16 = sshll.u32 %s323_s15, 3  ;;  %723 = vmatpush3.msra.mxu0 %v388_v8  ;;  %730 = vmatprep.mubr.msk.f32.mxu0 %vm892_vm1, %v891_v7  ;;  %v698_v15 = vld [vmem:[%s1095_s1] ss:$0 sm:$0xff]  ;;  %v482_v23 = vld [vmem:[%s1099_s5 + $0x30] sm:$0xff]  ;;  %v481_v24 = vld [vmem:[%s1099_s5 + $0x28] sm:$0xff]  ;;  %s705_s15 = sshll.u32 %s881_s27, 7 }
  0x17   : > { %s325_s19 = scalar_lea.vmem %s1094_s0, %s697_s16  ;;  %724 = vmatprep.subr.mxu0 %v891_v7  ;;  %749 = vmatprep.mubr.msk.f32.mxu1 %vm892_vm1, %v891_v7  ;;  %v699_v18 = vld [vmem:[%s1096_s2] ss:$0 sm:$0xff]  ;;  %v479_v26 = vld [vmem:[%s1099_s5 + $0x18] sm:$0xff]  ;;  %v478_v27 = vld [vmem:[%s1099_s5 + $0x10] sm:$0xff]  ;;  %s321_s16 = scalar_lea.vmem [#allocation4], %s696_s12 }
  0x18   : > { %v343_v0 = vld [vmem:[%s325_s19] sm:$0xff]  ;;  %725 = vmatpush3.msra.mxu0 %v387_v9  ;;  %734 = vmatpush3.msra.mxu1 %v483_v22  ;;  %v477_v28 = vld [vmem:[%s1099_s5 + $0x8] sm:$0xff]  ;;  %s579_s17 = sshll.u32 %s321_s16, 4  ;;  %s1053_s20 = scalar_lea.hbm %s1101_s7, %s705_s15  ;;  %s580_s17 = int_to_ptr.vmem [resolvable:$true] %s579_s17 }
  0x19   : > { %v345_v1 = vsel %vm344_vm0, %v343_v0, 0.0  ;;  %726 = vmatprep.subr.mxu0 %v891_v7  ;;  %735 = vmatprep.subr.mxu1 %v891_v7  ;;  %v480_v25 = vld [vmem:[%s1099_s5 + $0x20] sm:$0xff]  ;;  %s813_s22 = scalar_lea.vmem %s580_s17, 128  ;;  %s819_s27 = scalar_lea.vmem %s818_s30, 256 }
  0x1a   : > { %346 = vadd.xlane.f32.xlu0 %v345_v1  ;;  %727 = vmatpush3.msra.mxu0 %v386_v10  ;;  %v476_v29 = vld [vmem:[%s1099_s5] sm:$0xff]  ;;  %p814_p12 = scmp.ne.s32.totalorder %s580_s17, %s813_s22  ;;  %p820_p1 = scmp.lt.s32.totalorder %s580_s17, %s818_s30 }
  0x1b   : > { %728 = vmatprep.subr.mxu0 %v891_v7  ;;  %736 = vmatpush3.msra.mxu1 %v482_v23  ;;  %v700_v30 = vld [vmem:[%s1100_s6] ss:$0 sm:$0xff]  ;;  %p821_p2 = scmp.lt.s32.totalorder %s819_s27, %s813_s22 }
  0x1c   : > { %729 = vmatpush3.msra.mxu0 %v385_v11  ;;  %737 = vmatprep.subr.mxu1 %v891_v7  ;;  %383 = vst.msk [vmem:[#allocation3] sm:$0xff] %vm344_vm0, %v700_v30  ;;  %v701_v31 = vld [vmem:[%s1098_s4] ss:$0 sm:$0xff]  ;;  %p815_p13 = pnand %p814_p12, %p974_p4 }
  0x1d   : > { %738 = vmatpush3.msra.mxu1 %v481_v24  ;;  %p822_p3 = por %p821_p2, %p820_p1 }
  0x1e   : > { %739 = vmatprep.subr.mxu1 %v891_v7  ;;  %p816_p0 = pneg %p815_p13 }
  0x1f   : > { %740 = vmatpush3.msra.mxu1 %v480_v25 }
  0x20   : > { %741 = vmatprep.subr.mxu1 %v891_v7  ;;  %p823_p5 = pnand %p822_p3, %p816_p0 }
  0x21   : > { %742 = vmatpush3.msra.mxu1 %v479_v26 }
  0x22   : > { %743 = vmatprep.subr.mxu1 %v891_v7 }
  0x23   : > { %744 = vmatpush3.msra.mxu1 %v478_v27  ;;  %v475_v40 = vld [vmem:[#allocation3] sm:$0xff] }
  0x24   : > { %745 = vmatprep.subr.mxu1 %v891_v7 }
  0x25   : > { %746 = vmatpush3.msra.mxu1 %v477_v28 }
  0x26   : > { %747 = vmatprep.subr.mxu1 %v891_v7 }
  0x27   : > { %748 = vmatpush3.msra.mxu1 %v476_v29 }
  0xa3   : > { %v347_v2 = vpop.xlane.xlu0 %346 }
  0xa4   : > { %v349_v3 = vmul.f32 0.03125, %v347_v2 }
  0xa6   : > { %v350_v4 = vsub.f32 %v343_v0, %v349_v3 }
  0xa8   : > { %v351_v5 = vmul.f32 %v350_v4, %v350_v4 }
  0xaa   : > { %v352_v6 = vsel %vm344_vm0, %v351_v5, 0.0 }
  0xab   : > { %353 = vadd.xlane.f32.xlu0 %v352_v6 }
 0x134   : > { %v354_v12 = vpop.xlane.xlu0 %353 }
 0x135   : > { %v355_v13 = vmul.f32 0.03125, %v354_v12 }
 0x137   : > { %v356_v14 = vadd.f32 1e-05, %v355_v13 }
 0x139   : > { %809 = vrsqrt.f32 %v356_v14 }
 0x146   : > { %v810_v16 = vpop.eup %809 }
 0x147   : > { %v365_v17 = vmul.f32 %v810_v16, %v698_v15 }
 0x149   : > { %v366_v19 = vmul.f32 %v365_v17, %v350_v4 }
 0x14b   : > { %v374_v20 = vadd.f32 %v699_v18, %v366_v19 }
 0x14d   : > { %375 = vst.msk [vmem:[#allocation2] sm:$0xff] %vm344_vm0, %v374_v20 }
 0x154   : > { %v384_v21 = vld [vmem:[#allocation2] sm:$0xff] }
 0x155   : > { %731 = vmatmul.mubr.msk.f32.vlgmr.msra.gmra.mxu0 %vm344_vm0, %v384_v21 }
 0x215   : > { %v466_v32 = vpop.f32.mrf.mxu0 }
 0x216   : > { %v467_v33 = vadd.f32 %v701_v31, %v466_v32 }
 0x217   : > { %v732_v34 = vpop.f32.mrf.mxu0 }
 0x218   : > { %v471_v35 = vmul.f32 0.70710677, %v467_v33  ;;  %v470_v37 = vmul.f32 0.5, %v467_v33 }
 0x21a   : > { %811 = verf.f32 %v471_v35 }
 0x227   : > { %v812_v36 = vpop.eup %811 }
 0x228   : > { %v473_v38 = vadd.f32 1.0, %v812_v36 }
 0x22a   : > { %v474_v39 = vmul.f32 %v473_v38, %v470_v37 }
 0x22c   : > { %750 = vmatmul.mubr.msk.f32.vlgmr.msra.gmra.mxu1 %vm484_vm2, %v474_v39 }
 0x2ec   : > { %v554_v41 = vpop.f32.mrf.mxu1 }
 0x2ed   : > { %v558_v42 = vadd.f32 %v554_v41, %v475_v40 }
 0x2ee   : > { %v751_v43 = vpop.f32.mrf.mxu1 }
 0x2ef   : > { %559 = vst.msk [vmem:[#allocation3] sm:$0xff] %vm344_vm0, %v558_v42 }
 0x2f6   : > { %v563_v44 = vld [vmem:[#allocation3] sm:$0xff] }
 0x2f7   : > { %564 = vst.msk [vmem:[%s321_s16] sm:$0xff] %vm344_vm0, %v563_v44 }
 0x2f8   : > { %826 = shalt.err (!%p823_p5)
}
 0x2f9   : > { %s827_s8 = scalar_lea.hbm %s1053_s20, 128  ;;  %s831_s15 = scalar_lea.hbm %s1101_s7, 256 }
 0x2fa   : > { %p828_p6 = scmp.ne.s32.totalorder %s1053_s20, %s827_s8  ;;  %p832_p10 = scmp.lt.s32.totalorder %s1053_s20, %s1101_s7 }
 0x2fb   : > { %p833_p11 = scmp.lt.s32.totalorder %s831_s15, %s827_s8 }
 0x2fc   : > { %p829_p7 = pnand %p828_p6, %p974_p4 }
 0x2fd   : > { %p834_p12 = por %p833_p11, %p832_p10 }
 0x2fe   : > { %p830_p9 = pneg %p829_p7 }
 0x300   : > { %p835_p13 = pnand %p834_p12, %p830_p9 }
 0x302   : > { %838 = shalt.err (!%p835_p13)
}
 0x303   : > { %752 = dma.vmem_to_hbm [thread:$0]  (%p974_p4), %s580_s17, 128, %s1053_s20, %s566_s21  }
 0x304 PF: > { %p758_p0 = scmp.ge.s32.totalorder %s889_s29, 2  ;;  %s591_s19 = sand.u32 1, %s869_s24  }
 0x305   : > { %s592_s22 = scalar_lea.sflag [#allocation5], %s591_s19 }
 0x306   : > { %p755_p1 = pnand %p758_p0, %p981_p8 }
 0x308   : > { %p756_p2 = pneg %p755_p1 }
 0x30a   : > { %864 = dma.done.wait (%p756_p2), %s592_s22, 128  }
 0x30b   : > { %866 = vsyncadd (%p756_p2), %s592_s22, 4294967168  ;;  %s20_s29 = sadd.s32 1, %s889_s29   ;;  %s1104_s24 = smov %s873_s25 }
 0x30c   : > { %p17_p3 = scmp.ge.s32.totalorder %s20_s29, 4   ;;  %s1105_s25 = smov %s877_s26 }
 0x30d   : > { %s1106_s26 = smov %s987_s14  ;;  %s1107_s27 = smov %s885_s28 }
 0x30e   : > { %s1108_s28 = smov %s1110_s9  ;;  %19 = sbr.rel (!%p17_p3) target bundleno = 4 (0x4), region = 100 }
 0x313   :  { %597 = vsyncpa [#allocation5], 1 }
 0x314   :  { %599 = vsyncpa [#allocation5 + $0x1], 1 }

</bundles_post_ra>
